<compile_context>
chip_gen: v7x
topology: tpu7x:2x2x1
jax: 0.10.0
libtpu: 0.0.40
codegen_flags: <defaults>
</compile_context>

<pallas_src>
import jax
import jax.numpy as jnp
from jax.experimental import pallas as pl
from jax.experimental.pallas import tpu as pltpu

LANES = 128     # vreg lane width
SUBLANES = 8    # f32 sublane count


def ann_kernel(w1_ref, b1_ref, w2_ref, b2_ref, x0_ref, x1_ref, o_ref):
    # Hoist SMEM scalar reads / broadcasts once per block.
    w10 = w1_ref[0]
    w11 = w1_ref[1]
    b1 = b1_ref[0]
    w2 = w2_ref[0]
    b2 = b2_ref[0]

    # Linear(2, 1): h = x0*W1[0] + x1*W1[1] + b1   on full (block_rows, 128) tiles
    h = x0_ref[...] * w10 + x1_ref[...] * w11 + b1
    # ReLU (VPU)
    h = jnp.maximum(h, 0.0)
    # Linear(1, 1): y = h*W2 + b2
    y = h * w2 + b2
    # Sigmoid (EUP transcendental slot — plenty of slack at HBM roofline)
    o_ref[...] = jax.nn.sigmoid(y)


def _round_up(a, b):
    return ((a + b - 1) // b) * b


def ann_forward(x, w1, b1, w2, b2, *, max_block_rows=512):
    """Forward pass of customANNClass. x: (N, 2) -> (N, 1)."""
    n = x.shape[0]
    dtype = x.dtype

    # ---- wrapper-side lane-dense relayout -------------------------------
    rows = pl.cdiv(n, LANES)                       # rows of 128 lanes needed
    if rows >= max_block_rows:
        block_rows = max_block_rows
        padded_rows = _round_up(rows, block_rows)
    else:
        padded_rows = _round_up(rows, SUBLANES)    # (8,128) rule
        block_rows = padded_rows
    padded_n = padded_rows * LANES

    xp = jnp.pad(x, ((0, padded_n - n), (0, 0)))   # zero-pad the batch tail
    x0 = xp[:, 0].reshape(padded_rows, LANES)
    x1 = xp[:, 1].reshape(padded_rows, LANES)

    grid = (padded_rows // block_rows,)

    out = pl.pallas_call(
        ann_kernel,
        out_shape=jax.ShapeDtypeStruct((padded_rows, LANES), dtype),
        grid=grid,
        in_specs=[
            pl.BlockSpec(memory_space=pltpu.MemorySpace.SMEM),   # w1 (2,)
            pl.BlockSpec(memory_space=pltpu.MemorySpace.SMEM),   # b1 (1,)
            pl.BlockSpec(memory_space=pltpu.MemorySpace.SMEM),   # w2 (1,)
            pl.BlockSpec(memory_space=pltpu.MemorySpace.SMEM),   # b2 (1,)
            pl.BlockSpec((block_rows, LANES), lambda i: (i, 0)),  # x0
            pl.BlockSpec((block_rows, LANES), lambda i: (i, 0)),  # x1
        ],
        out_specs=pl.BlockSpec((block_rows, LANES), lambda i: (i, 0)),
        compiler_params=pltpu.CompilerParams(
            dimension_semantics=("parallel",)),
    )(w1, b1, w2, b2, x0, x1)

    # Back to PyTorch layout (N, 1), dropping the padded tail.
    return out.reshape(padded_n, 1)[:n]


def reference_forward(x, w1, b1, w2, b2):
    h = x @ w1.reshape(2, 1) + b1
    h = jnp.maximum(h, 0.0)
    y = h * w2 + b2
    return jax.nn.sigmoid(y)


if __name__ == "__main__":
    key = jax.random.PRNGKey(0)
    k_x, k_w1, k_b1, k_w2, k_b2, k_x2 = jax.random.split(key, 6)

    # Deterministic parameter init mimicking PyTorch nn.Linear default
    # (uniform in +/- 1/sqrt(fan_in)).
    bound1 = 1.0 / jnp.sqrt(2.0)   # input layer: fan_in = 2
    bound2 = 1.0                   # output layer: fan_in = 1
    w1 = jax.random.uniform(k_w1, (2,), jnp.float32, -bound1, bound1)  # Linear(2,1).weight
    b1 = jax.random.uniform(k_b1, (1,), jnp.float32, -bound1, bound1)  # Linear(2,1).bias
    w2 = jax.random.uniform(k_w2, (1,), jnp.float32, -bound2, bound2)  # Linear(1,1).weight
    b2 = jax.random.uniform(k_b2, (1,), jnp.float32, -bound2, bound2)  # Linear(1,1).bias

    # Small batch consistent with the module's forward (in_features = 2).
    x = jax.random.normal(k_x, (8, 2), jnp.float32)
    out = jax.block_until_ready(ann_forward(x, w1, b1, w2, b2))
    ref = reference_forward(x, w1, b1, w2, b2)
    assert out.shape == (8, 1)
    assert jnp.allclose(out, ref, atol=2e-6, rtol=2e-6)

    # Exercise the batch grid + tail padding path (multiple grid steps).
    x_big = jax.random.normal(k_x2, (3000, 2), jnp.float32)
    out_big = jax.block_until_ready(
        ann_forward(x_big, w1, b1, w2, b2, max_block_rows=8))
    ref_big = reference_forward(x_big, w1, b1, w2, b2)
    assert out_big.shape == (3000, 1)
    assert jnp.allclose(out_big, ref_big, atol=2e-6, rtol=2e-6)

    print("KERNEL_OK")
</pallas_src>

<mosaic_0001>
module attributes {stable_mosaic.version = 11 : i64} {
  func.func @ann_kernel(%arg0: i32, %arg1: memref<2xf32, #tpu.memory_space<smem>>, %arg2: memref<1xf32, #tpu.memory_space<smem>>, %arg3: memref<1xf32, #tpu.memory_space<smem>>, %arg4: memref<1xf32, #tpu.memory_space<smem>>, %arg5: memref<8x128xf32, #tpu.memory_space<vmem>>, %arg6: memref<8x128xf32, #tpu.memory_space<vmem>>, %arg7: memref<8x128xf32, #tpu.memory_space<vmem>>) attributes {dimension_semantics = [#tpu.dimension_semantics<parallel>], iteration_bounds = array<i64: 1>, scalar_prefetch = 0 : i64, scratch_operands = 0 : i64, tpu.core_type = #tpu.core_type<tc>, window_params = [{transform_indices = @transform_0, window_bounds = array<i64: 2>}, {transform_indices = @transform_1, window_bounds = array<i64: 1>}, {transform_indices = @transform_2, window_bounds = array<i64: 1>}, {transform_indices = @transform_3, window_bounds = array<i64: 1>}, {transform_indices = @transform_4, window_bounds = array<i64: 8, 128>}, {transform_indices = @transform_5, window_bounds = array<i64: 8, 128>}, {transform_indices = @transform_6, window_bounds = array<i64: 8, 128>}]} {
    %c0 = arith.constant 0 : index
    %0 = memref.load %arg1[%c0] : memref<2xf32, #tpu.memory_space<smem>>
    %c1 = arith.constant 1 : index
    %1 = memref.load %arg1[%c1] : memref<2xf32, #tpu.memory_space<smem>>
    %c0_0 = arith.constant 0 : index
    %2 = memref.load %arg2[%c0_0] : memref<1xf32, #tpu.memory_space<smem>>
    %c0_1 = arith.constant 0 : index
    %3 = memref.load %arg3[%c0_1] : memref<1xf32, #tpu.memory_space<smem>>
    %c0_2 = arith.constant 0 : index
    %4 = memref.load %arg4[%c0_2] : memref<1xf32, #tpu.memory_space<smem>>
    %c0_3 = arith.constant 0 : index
    %c0_4 = arith.constant 0 : index
    %5 = vector.load %arg5[%c0_3, %c0_4] : memref<8x128xf32, #tpu.memory_space<vmem>>, vector<8x128xf32>
    %6 = vector.broadcast %0 : f32 to vector<8x128xf32>
    %7 = arith.mulf %5, %6 : vector<8x128xf32>
    %c0_5 = arith.constant 0 : index
    %c0_6 = arith.constant 0 : index
    %8 = vector.load %arg6[%c0_5, %c0_6] : memref<8x128xf32, #tpu.memory_space<vmem>>, vector<8x128xf32>
    %9 = vector.broadcast %1 : f32 to vector<8x128xf32>
    %10 = arith.mulf %8, %9 : vector<8x128xf32>
    %11 = arith.addf %7, %10 : vector<8x128xf32>
    %12 = vector.broadcast %2 : f32 to vector<8x128xf32>
    %13 = arith.addf %11, %12 : vector<8x128xf32>
    %cst = arith.constant 0.000000e+00 : f32
    %14 = vector.broadcast %cst : f32 to vector<8x128xf32>
    %15 = arith.maximumf %13, %14 : vector<8x128xf32>
    %16 = vector.broadcast %3 : f32 to vector<8x128xf32>
    %17 = arith.mulf %15, %16 : vector<8x128xf32>
    %18 = vector.broadcast %4 : f32 to vector<8x128xf32>
    %19 = arith.addf %17, %18 : vector<8x128xf32>
    %20 = arith.negf %19 : vector<8x128xf32>
    %21 = math.exp %20 : vector<8x128xf32>
    %cst_7 = arith.constant 1.000000e+00 : f32
    %22 = vector.broadcast %cst_7 : f32 to vector<8x128xf32>
    %23 = arith.addf %22, %21 : vector<8x128xf32>
    %24 = arith.divf %22, %23 : vector<8x128xf32>
    %c0_8 = arith.constant 0 : index
    %c0_9 = arith.constant 0 : index
    %25 = vector.load %arg7[%c0_8, %c0_9] : memref<8x128xf32, #tpu.memory_space<vmem>>, vector<8x128xf32>
    tpu.vector_store %arg7[%c0_8, %c0_9], %24 {strides = array<i32>} : memref<8x128xf32, #tpu.memory_space<vmem>>, vector<8x128xf32>,
    return
  }
  func.func @transform_0(%arg0: i32) -> i32 {
    %c0_i32 = arith.constant 0 : i32
    %c0_i32_0 = arith.constant 0 : i32
    return %c0_i32 : i32
  }
  func.func @transform_1(%arg0: i32) -> i32 {
    %c0_i32 = arith.constant 0 : i32
    %c0_i32_0 = arith.constant 0 : i32
    return %c0_i32 : i32
  }
  func.func @transform_2(%arg0: i32) -> i32 {
    %c0_i32 = arith.constant 0 : i32
    %c0_i32_0 = arith.constant 0 : i32
    return %c0_i32 : i32
  }
  func.func @transform_3(%arg0: i32) -> i32 {
    %c0_i32 = arith.constant 0 : i32
    %c0_i32_0 = arith.constant 0 : i32
    return %c0_i32 : i32
  }
  func.func @transform_4(%arg0: i32) -> (i32, i32) {
    %c0_i32 = arith.constant 0 : i32
    %c0_i32_0 = arith.constant 0 : i32
    return %arg0, %c0_i32 : i32, i32
  }
  func.func @transform_5(%arg0: i32) -> (i32, i32) {
    %c0_i32 = arith.constant 0 : i32
    %c0_i32_0 = arith.constant 0 : i32
    return %arg0, %c0_i32 : i32, i32
  }
  func.func @transform_6(%arg0: i32) -> (i32, i32) {
    %c0_i32 = arith.constant 0 : i32
    %c0_i32_0 = arith.constant 0 : i32
    return %arg0, %c0_i32 : i32, i32
  }
}

</mosaic_0001>

<bundles_post_ra>
// kernel: tpu_custom_call.1
= control target key start
LH: loop header
LB: loop body
LE: loop exit
PB: predicated region body
PF: predicated region fallthrough
CT: control target
= control target key end

     0   :  { %14 = vsyncpa [#allocation7], 0  ;;  %s194_s0 = inlined_call_operand.vmem [shape: f32[2], index: 0, kind: input, shape index: {}]   ;;  %s195_s1 = inlined_call_operand.<no memory space> [shape: f32[1], index: 1, kind: input, shape index: {}]   ;;  %s196_s2 = inlined_call_operand.<no memory space> [shape: f32[1], index: 2, kind: input, shape index: {}]   ;;  %s197_s3 = inlined_call_operand.<no memory space> [shape: f32[1], index: 3, kind: input, shape index: {}]   ;;  %s198_s4 = inlined_call_operand.vmem [shape: f32[8,128], index: 4, kind: input, shape index: {}]   ;;  %s199_s5 = inlined_call_operand.vmem [shape: f32[8,128], index: 5, kind: input, shape index: {}]   ;;  %s200_s6 = inlined_call_operand.hbm [shape: f32[8,128], index: 6, kind: output, shape index: {}]  }
   0x1   :  { %15 = vsyncpa [#allocation6], 0  ;;  %s22_s23 = sshll.u32 %s194_s0, 4  ;;  %s23_s23 = int_to_ptr.vmem [resolvable:$true] %s22_s23 }
   0x2   :  { %s89_s24 = scalar_lea.vmem %s23_s23, 16  ;;  %p94_p1 = scmp.lt.s32.totalorder %s23_s23, %s23_s23 }
   0x3   :  { %p90_p0 = scmp.ne.s32.totalorder %s23_s23, %s89_s24  ;;  %p95_p2 = scmp.lt.s32.totalorder %s89_s24, %s89_s24 }
   0x5   :  { %p96_p3 = por %p95_p2, %p94_p1 }
   0x7   :  { %p97_p4 = pnand %p96_p3, %p90_p0 }
   0x9   :  { %100 = shalt.err (!%p97_p4)
}
   0xa   :  { %s127_s25 = smov [#allocation5]  }
   0xb   :  { %25 = dma.vmem_to_smem %s23_s23, 16, %s127_s25, [#allocation7]  }
   0xc   :  { %123 = dma.done.wait [#allocation7], 16  }
   0xd   :  { %124 = vsyncadd [#allocation7], 4294967280 }
   0xe   :  { %39 = sfence }
   0xf   :  { %s40_s26 = sld [smem:[#allocation5]]  ;;  %s81_s27 = sld [smem:[#allocation5 + $0x1]]  ;;  %v45_v0 = vld [vmem:[%s198_s4] sm:$0xff]  ;;  %v52_v6 = vstv %s195_s1  ;;  %v55_v9 = vstv %s196_s2  ;;  %v57_v11 = vstv %s197_s3 }
  0x10   :  { %v48_v1 = vld [vmem:[%s199_s5] sm:$0xff]  ;;  %s128_s5 = smov [#allocation8]  }
  0x11   :  { %s72_s1 = sshll.u32 %s128_s5, 4  ;;  %s73_s1 = int_to_ptr.vmem [resolvable:$true] %s72_s1 }
  0x12   :  { %s101_s12 = scalar_lea.vmem %s73_s1, 128  ;;  %p106_p6 = scmp.lt.s32.totalorder %s73_s1, %s73_s1 }
  0x13   :  { %p102_p5 = scmp.ne.s32.totalorder %s73_s1, %s101_s12  ;;  %p107_p7 = scmp.lt.s32.totalorder %s101_s12, %s101_s12 }
  0x15   :  { %v46_v2 = vstv %s40_s26  ;;  %v49_v3 = vstv %s81_s27  ;;  %p108_p8 = por %p107_p7, %p106_p6 }
  0x16   :  { %v47_v4 = vmul.f32 %v46_v2, %v45_v0  ;;  %v50_v5 = vmul.f32 %v49_v3, %v48_v1 }
  0x17   :  { %p109_p9 = pnand %p108_p8, %p102_p5 }
  0x18   :  { %v51_v7 = vadd.f32 %v50_v5, %v47_v4 }
  0x1a   :  { %v53_v8 = vadd.f32 %v52_v6, %v51_v7 }
  0x1c   :  { %v54_v10 = vmax.f32 %v53_v8, 0.0 }
  0x1e   :  { %v56_v12 = vmul.f32 %v55_v9, %v54_v10 }
  0x20   :  { %v58_v13 = vadd.f32 %v57_v11, %v56_v12 }
  0x22   :  { %v82_v14 = vmul.f32 -1.442695, %v58_v13 }
  0x24   :  { %85 = vpow2.f32 %v82_v14 }
  0x2e   :  { %v86_v15 = vpop.eup %85 }
  0x2f   :  { %v62_v16 = vadd.f32 1.0, %v86_v15 }
  0x31   :  { %87 = vrcp.f32 %v62_v16 }
  0x3b   :  { %v88_v17 = vpop.eup %87 }
  0x3c   :  { %65 = vst [vmem:[#allocation8] sm:$0xff] %v88_v17 }
  0x3d   :  { %112 = shalt.err (!%p109_p9)
}
  0x3e   :  { %s113_s13 = scalar_lea.hbm %s200_s6, 128 }
  0x3f   :  { %p114_p10 = scmp.ne.s32.totalorder %s200_s6, %s113_s13  ;;  %p117_p11 = scmp.lt.u32.totalorder %s113_s13, %s200_s6 }
  0x41   :  { %p119_p12 = pnand %p117_p11, %p114_p10 }
  0x43   :  { %122 = shalt.err (!%p119_p12)
}
  0x44   :  { %75 = dma.vmem_to_hbm [thread:$0]  %s73_s1, 128, %s200_s6, [#allocation6]  }
  0x45   :  { %125 = dma.done.wait [#allocation6], 128  }
  0x46   :  { %126 = vsyncadd [#allocation6], 4294967168 }
  0x47   :  { %79 = vsyncpa [#allocation6], 1 }
  0x48   :  { %80 = vsyncpa [#allocation7], 1 }

</bundles_post_ra>
